<compile_context>
chip_gen: v7x
topology: tpu7x:2x2x1
jax: 0.10.0
libtpu: 0.0.40
codegen_flags: <defaults>
</compile_context>

<pallas_src>
import jax
import jax.numpy as jnp
from jax.experimental import pallas as pl
from jax.experimental.pallas import tpu as pltpu

F32 = jnp.float32
F32_BYTES = 4


def _round_up(x, m):
    return (x + m - 1) // m * m


# ---------------------------------------------------------------------------
# Kernels
# ---------------------------------------------------------------------------

def _gru_fused_kernel(x_ref, h_ref, w_ref, b_ref, o_ref, xh_ref):
    """Small-H path: one [tm, 2hp] @ [2hp, 4hp] matmul against resident packed W.

    Packed output columns: [r_sum | z_sum | i2h_n | h2h_n]; r/z biases are
    pre-summed into the packed bias.  x arrives in the compute dtype; h arrives
    in f32 (carry path) and is cast in-kernel for the matmul.  The x/h concat
    happens in a VMEM scratch (no HBM round trip).
    """
    hp = o_ref.shape[-1]
    h32 = h_ref[...]                                     # [tm, hp] f32 carry
    xh_ref[:, 0:hp] = x_ref[...]
    xh_ref[:, hp:2 * hp] = h32.astype(xh_ref.dtype)
    s = jnp.dot(xh_ref[...], w_ref[...],
                preferred_element_type=jnp.float32) + b_ref[...]
    reset_gate = jax.nn.sigmoid(s[:, 0:hp])
    update_gate = jax.nn.sigmoid(s[:, hp:2 * hp])
    next_h_tmp = jnp.tanh(s[:, 2 * hp:3 * hp] + reset_gate * s[:, 3 * hp:4 * hp])
    o_ref[...] = ((1.0 - update_gate) * next_h_tmp
                  + update_gate * h32).astype(o_ref.dtype)


def _gru_split_kernel(x_ref, h_ref, wi_ref, wh_ref, b_ref, o_ref):
    """Large-H path: dots against resident [hp, 3hp] weights.

    The r/z columns of i2h and h2h are accumulated together (single [tm, 2hp]
    f32 intermediate) instead of materializing both [tm, 3hp] activations,
    cutting kernel VMEM pressure by ~1/3.  Bias layout is the shared
    [1, 4hp] = [b_r_sum | b_z_sum | b_n_i2h | b_n_h2h].
    """
    hp = o_ref.shape[-1]
    x = x_ref[...]                                       # [tm, hp] compute dtype
    h32 = h_ref[...]                                     # [tm, hp] f32 carry
    h = h32.astype(x.dtype)
    rz = (jnp.dot(x, wi_ref[:, 0:2 * hp], preferred_element_type=jnp.float32)
          + jnp.dot(h, wh_ref[:, 0:2 * hp], preferred_element_type=jnp.float32)
          + b_ref[:, 0:2 * hp])
    i2h_n = (jnp.dot(x, wi_ref[:, 2 * hp:3 * hp], preferred_element_type=jnp.float32)
             + b_ref[:, 2 * hp:3 * hp])
    h2h_n = (jnp.dot(h, wh_ref[:, 2 * hp:3 * hp], preferred_element_type=jnp.float32)
             + b_ref[:, 3 * hp:4 * hp])
    reset_gate = jax.nn.sigmoid(rz[:, 0:hp])
    update_gate = jax.nn.sigmoid(rz[:, hp:2 * hp])
    next_h_tmp = jnp.tanh(i2h_n + reset_gate * h2h_n)
    o_ref[...] = ((1.0 - update_gate) * next_h_tmp
                  + update_gate * h32).astype(o_ref.dtype)


# ---------------------------------------------------------------------------
# Weight packing (run once per layer, outside the per-step call)
# ---------------------------------------------------------------------------

def _default_fuse(hp):
    """Fused single-matmul threshold, per generation.

    v6e/v7x MXUs are 256 deep, so fusing two K=hp matmuls into one K=2*hp
    matmul improves fill for hp <= 256 (worth the +33% padded FLOPs in the
    latency-bound small-H regime).  v5e's MXU is 128 deep: no fill benefit
    beyond hp == 128.
    """
    try:
        kind = jax.devices()[0].device_kind.lower()
    except Exception:  # pragma: no cover
        kind = ""
    if "v5 lite" in kind or "v5lite" in kind or "v5e" in kind:
        return hp <= 128
    return hp <= 256


def _pad_gate_block(w, H, hp, g):
    """[H, 3H] weight -> one [hp, hp] gate block (zero padded, lane aligned)."""
    return jnp.pad(w[:, g * H:(g + 1) * H], ((0, hp - H), (0, hp - H)))


def _pad_gate_bias(b, H, hp, g):
    return jnp.pad(b[g * H:(g + 1) * H], (0, hp - H))


def pack_gru_weights(w_i2h, b_i2h, w_h2h, b_h2h, *,
                     compute_dtype=jnp.bfloat16, fuse=None):
    """Pad / cast / pack the GRU weights once (hoisted out of per-step calls).

    w_i2h, w_h2h: [H, 3H] pre-transposed nn.Linear weights (gate order r, z, n).
    b_i2h, b_h2h: [3H].
    """
    H = w_i2h.shape[0]
    hp = _round_up(max(H, 128), 128)
    if fuse is None:
        fuse = _default_fuse(hp)
    # Shared bias layout [1, 4hp]: [b_r(i2h+h2h) | b_z(i2h+h2h) | b_n(i2h) | b_n(h2h)].
    bias = jnp.concatenate([
        _pad_gate_bias(b_i2h, H, hp, 0) + _pad_gate_bias(b_h2h, H, hp, 0),
        _pad_gate_bias(b_i2h, H, hp, 1) + _pad_gate_bias(b_h2h, H, hp, 1),
        _pad_gate_bias(b_i2h, H, hp, 2),
        _pad_gate_bias(b_h2h, H, hp, 2),
    ]).astype(F32).reshape(1, 4 * hp)
    packed = dict(H=H, hp=hp, fuse=bool(fuse), compute_dtype=compute_dtype, bias=bias)
    if fuse:
        zeros = jnp.zeros((hp, hp), w_i2h.dtype)
        top = jnp.concatenate([_pad_gate_block(w_i2h, H, hp, 0),
                               _pad_gate_block(w_i2h, H, hp, 1),
                               _pad_gate_block(w_i2h, H, hp, 2), zeros], axis=1)
        bot = jnp.concatenate([_pad_gate_block(w_h2h, H, hp, 0),
                               _pad_gate_block(w_h2h, H, hp, 1),
                               zeros, _pad_gate_block(w_h2h, H, hp, 2)], axis=1)
        packed["w"] = jnp.concatenate([top, bot], axis=0).astype(compute_dtype)  # [2hp,4hp]
    else:
        packed["wi"] = jnp.concatenate(
            [_pad_gate_block(w_i2h, H, hp, g) for g in range(3)], axis=1).astype(compute_dtype)
        packed["wh"] = jnp.concatenate(
            [_pad_gate_block(w_h2h, H, hp, g) for g in range(3)], axis=1).astype(compute_dtype)
    return packed


# ---------------------------------------------------------------------------
# pallas_call plumbing
# ---------------------------------------------------------------------------

def _vmem_cap_bytes():
    """~80% of this generation's physical VMEM (128 MiB v5e/v6e, 64 MiB v7x)."""
    try:
        return int(pltpu.get_tpu_info().vmem_capacity_bytes * 4 // 5)
    except Exception:  # pragma: no cover
        return 48 * 2 ** 20  # conservative (v7x-safe) fallback


def _compiler_params(resident_bytes, streamed_bytes_per_step, intermediate_bytes):
    kwargs = dict(dimension_semantics=("parallel",))
    # residents single-buffered, streams double-buffered, 1.5x headroom.
    need = (resident_bytes + 2 * streamed_bytes_per_step + intermediate_bytes) * 3 // 2
    if need > 12 * 2 ** 20:
        kwargs["vmem_limit_bytes"] = int(min(max(need, 32 * 2 ** 20), _vmem_cap_bytes()))
    return pltpu.CompilerParams(**kwargs)


def _resident_spec(shape, buffer_count):
    zeros = (0,) * len(shape)
    index_map = lambda i, _z=zeros: _z
    if buffer_count is None:
        return pl.BlockSpec(shape, index_map)
    return pl.BlockSpec(shape, index_map, pipeline_mode=pl.Buffered(buffer_count))


def _run_pallas(kernel, args, *, out_shape, grid, stream_specs, resident_shapes,
                out_spec, scratch_shapes, compiler_params):
    """Run pallas_call; residents requested single-buffered, with a fallback
    to default pipelining if this JAX build rejects pipeline_mode/Buffered(1)."""
    last_err = None
    for resident_buffers in (1, None):
        try:
            in_specs = list(stream_specs) + [
                _resident_spec(s, resident_buffers) for s in resident_shapes]
            fn = pl.pallas_call(
                kernel,
                out_shape=out_shape,
                grid=grid,
                in_specs=in_specs,
                out_specs=out_spec,
                scratch_shapes=scratch_shapes,
                compiler_params=compiler_params)
            return fn(*args)
        except Exception as e:  # pragma: no cover - fallback for older jax
            last_err = e
    raise last_err


# ---------------------------------------------------------------------------
# Public wrappers
# ---------------------------------------------------------------------------

def gru_cell_packed(inputs, prev_h, packed, *, block_b=None, out_dtype=None):
    """GRUCell forward from pre-packed weights (pack_gru_weights).

    inputs, prev_h: [B, H].  Returns (next_h, [next_h]) like the PyTorch module.
    """
    B, H = inputs.shape
    if H != packed["H"]:
        raise ValueError(f"hidden dim mismatch: inputs {H} vs packed {packed['H']}")
    hp = packed["hp"]
    cd = packed["compute_dtype"]
    cd_bytes = jnp.dtype(cd).itemsize
    out_dtype = inputs.dtype if out_dtype is None else out_dtype
    out_bytes = jnp.dtype(out_dtype).itemsize

    # Batch tiling: lane-aligned hp, sublane-aligned tm.  Large tiles amortize
    # the ~0.35us/step overhead; force >=2 grid steps when possible so the
    # "parallel" batch axis can use both TensorCores on v7x.
    bp8 = _round_up(max(B, 8), 8)
    if block_b is None:
        block_b = 512 if hp <= 512 else 256
    tm = min(block_b, bp8)
    if bp8 <= tm and bp8 >= 16:
        tm = _round_up(bp8 // 2, 8)
    bp = _round_up(bp8, tm)
    grid = (bp // tm,)

    # Stream x narrow (compute dtype); stream h once in f32 (matmul operand,
    # cast in-kernel, AND the f32 carry path).  Skip pads when already aligned.
    x_c = inputs.astype(cd)
    h_c = prev_h.astype(F32)
    if bp != B or hp != H:
        x_c = jnp.pad(x_c, ((0, bp - B), (0, hp - H)))
        h_c = jnp.pad(h_c, ((0, bp - B), (0, hp - H)))

    stream_specs = [pl.BlockSpec((tm, hp), lambda i: (i, 0)),   # x (streamed)
                    pl.BlockSpec((tm, hp), lambda i: (i, 0))]   # h (streamed)
    out_spec = pl.BlockSpec((tm, hp), lambda i: (i, 0))
    streamed = tm * hp * (cd_bytes + F32_BYTES + out_bytes)

    if packed["fuse"]:
        w, b = packed["w"], packed["bias"]
        resident = w.size * cd_bytes + b.size * F32_BYTES
        interm = tm * hp * (2 * cd_bytes + 8 * F32_BYTES)       # xh scratch + s + gates
        out = _run_pallas(
            _gru_fused_kernel, (x_c, h_c, w, b),
            out_shape=jax.ShapeDtypeStruct((bp, hp), out_dtype),
            grid=grid,
            stream_specs=stream_specs,
            resident_shapes=[(2 * hp, 4 * hp), (1, 4 * hp)],
            out_spec=out_spec,
            scratch_shapes=[pltpu.VMEM((tm, 2 * hp), cd)],
            compiler_params=_compiler_params(resident, streamed, interm))
    else:
        wi, wh, b = packed["wi"], packed["wh"], packed["bias"]
        resident = (wi.size + wh.size) * cd_bytes + b.size * F32_BYTES
        interm = tm * hp * 8 * F32_BYTES                         # rz + n-terms + gates
        out = _run_pallas(
            _gru_split_kernel, (x_c, h_c, wi, wh, b),
            out_shape=jax.ShapeDtypeStruct((bp, hp), out_dtype),
            grid=grid,
            stream_specs=stream_specs,
            resident_shapes=[(hp, 3 * hp), (hp, 3 * hp), (1, 4 * hp)],
            out_spec=out_spec,
            scratch_shapes=[],
            compiler_params=_compiler_params(resident, streamed, interm))

    next_h = out[:B, :H]
    return next_h, [next_h]


def gru_cell(inputs, prev_h, w_i2h, b_i2h, w_h2h, b_h2h, *,
             compute_dtype=jnp.bfloat16, fuse=None, block_b=None, out_dtype=None):
    """Convenience entry point: packs weights then runs one step.

    For sequence stepping, call pack_gru_weights once and use gru_cell_packed.
    """
    packed = pack_gru_weights(w_i2h, b_i2h, w_h2h, b_h2h,
                              compute_dtype=compute_dtype, fuse=fuse)
    return gru_cell_packed(inputs, prev_h, packed, block_b=block_b, out_dtype=out_dtype)


def gru_cell_ref(inputs, prev_h, w_i2h, b_i2h, w_h2h, b_h2h):
    """Pure-JAX reference matching the PyTorch forward (full f32 precision)."""
    hi = jax.lax.Precision.HIGHEST
    i2h = jnp.dot(inputs, w_i2h, precision=hi) + b_i2h
    h2h = jnp.dot(prev_h, w_h2h, precision=hi) + b_h2h
    i2h_r, i2h_z, i2h_n = jnp.split(i2h, 3, axis=-1)
    h2h_r, h2h_z, h2h_n = jnp.split(h2h, 3, axis=-1)
    reset_gate = jax.nn.sigmoid(i2h_r + h2h_r)
    update_gate = jax.nn.sigmoid(i2h_z + h2h_z)
    next_h_tmp = jnp.tanh(i2h_n + reset_gate * h2h_n)
    return (1.0 - update_gate) * next_h_tmp + update_gate * prev_h


if __name__ == "__main__":
    key = jax.random.PRNGKey(0)

    def make_case(k, B, H):
        k_x, k_h, k_wi, k_bi, k_wh, k_bh = jax.random.split(k, 6)
        bound = 1.0 / float(H) ** 0.5            # nn.Linear-style uniform init
        w_i2h = jax.random.uniform(k_wi, (H, 3 * H), jnp.float32, -bound, bound)
        b_i2h = jax.random.uniform(k_bi, (3 * H,), jnp.float32, -bound, bound)
        w_h2h = jax.random.uniform(k_wh, (H, 3 * H), jnp.float32, -bound, bound)
        b_h2h = jax.random.uniform(k_bh, (3 * H,), jnp.float32, -bound, bound)
        x = jax.random.normal(k_x, (B, H), jnp.float32)
        h = jax.random.normal(k_h, (B, H), jnp.float32)
        return x, h, w_i2h, b_i2h, w_h2h, b_h2h

    k1, k2, k3 = jax.random.split(key, 3)

    # Case 1: small H -> fused single-matmul path (H padded 32 -> 128).
    args = make_case(k1, 8, 32)
    ref = gru_cell_ref(*args)

    out_bf16, states = gru_cell(*args)                         # bf16 streams + MXU
    out_bf16 = jax.block_until_ready(out_bf16)
    assert out_bf16.shape == ref.shape
    assert jnp.allclose(out_bf16, ref, atol=5e-2, rtol=5e-2), "fused bf16 path mismatch"
    assert jnp.allclose(states[0], out_bf16)

    out_f32, _ = gru_cell(*args, compute_dtype=jnp.float32)    # full-precision path
    out_f32 = jax.block_until_ready(out_f32)
    assert jnp.allclose(out_f32, ref, atol=1e-3, rtol=1e-3), "fused f32 path mismatch"

    # Case 2: larger H -> split two-matmul path; B=16 exercises the 2-step grid.
    args2 = make_case(k2, 16, 384)
    ref2 = gru_cell_ref(*args2)
    out2, _ = gru_cell(*args2)
    out2 = jax.block_until_ready(out2)
    assert out2.shape == ref2.shape
    assert jnp.allclose(out2, ref2, atol=5e-2, rtol=5e-2), "split bf16 path mismatch"

    # Case 3: pack once, step a short sequence (the intended per-step usage).
    x3, h3, *w3 = make_case(k3, 8, 32)
    packed = pack_gru_weights(*w3, compute_dtype=jnp.float32)
    seq = jax.random.normal(jax.random.PRNGKey(42), (3, 8, 32), jnp.float32)
    h_ker = h3
    h_exp = h3
    for t in range(seq.shape[0]):
        h_ker, _ = gru_cell_packed(seq[t], h_ker, packed)
        h_exp = gru_cell_ref(seq[t], h_exp, *w3)
    h_ker = jax.block_until_ready(h_ker)
    assert jnp.allclose(h_ker, h_exp, atol=2e-3, rtol=2e-3), "packed sequence mismatch"

    print("KERNEL_OK")
</pallas_src>

<mosaic_0001>
module attributes {stable_mosaic.version = 11 : i64} {
  func.func @_gru_fused_kernel(%arg0: i32, %arg1: memref<8x128xbf16, #tpu.memory_space<vmem>>, %arg2: memref<8x128xf32, #tpu.memory_space<vmem>>, %arg3: memref<256x512xbf16, #tpu.memory_space<vmem>>, %arg4: memref<1x512xf32, #tpu.memory_space<vmem>>, %arg5: memref<8x128xf32, #tpu.memory_space<vmem>>, %arg6: memref<8x256xbf16, #tpu.memory_space<vmem>>) attributes {dimension_semantics = [#tpu.dimension_semantics<parallel>], iteration_bounds = array<i64: 1>, scalar_prefetch = 0 : i64, scratch_operands = 1 : i64, tpu.core_type = #tpu.core_type<tc>, window_params = [{transform_indices = @transform_0, window_bounds = array<i64: 8, 128>}, {transform_indices = @transform_1, window_bounds = array<i64: 8, 128>}, {pipeline_mode = #tpu.pipeline_mode<synchronous>, transform_indices = @transform_2, window_bounds = array<i64: 256, 512>}, {pipeline_mode = #tpu.pipeline_mode<synchronous>, transform_indices = @transform_3, window_bounds = array<i64: 1, 512>}, {transform_indices = @transform_4, window_bounds = array<i64: 8, 128>}]} {
    %c0 = arith.constant 0 : index
    %c0_0 = arith.constant 0 : index
    %0 = vector.load %arg2[%c0, %c0_0] : memref<8x128xf32, #tpu.memory_space<vmem>>, vector<8x128xf32>
    %c0_1 = arith.constant 0 : index
    %c0_2 = arith.constant 0 : index
    %1 = vector.load %arg1[%c0_1, %c0_2] : memref<8x128xbf16, #tpu.memory_space<vmem>>, vector<8x128xbf16>
    %c0_3 = arith.constant 0 : index
    %c0_4 = arith.constant 0 : index
    %2 = vector.load %arg6[%c0_3, %c0_4] : memref<8x256xbf16, #tpu.memory_space<vmem>>, vector<8x128xbf16>
    tpu.vector_store %arg6[%c0_3, %c0_4], %1 {strides = array<i32>} : memref<8x256xbf16, #tpu.memory_space<vmem>>, vector<8x128xbf16>,
    %3 = arith.truncf %0 : vector<8x128xf32> to vector<8x128xbf16>
    %c0_5 = arith.constant 0 : index
    %c128 = arith.constant 128 : index
    %4 = vector.load %arg6[%c0_5, %c128] : memref<8x256xbf16, #tpu.memory_space<vmem>>, vector<8x128xbf16>
    tpu.vector_store %arg6[%c0_5, %c128], %3 {strides = array<i32>} : memref<8x256xbf16, #tpu.memory_space<vmem>>, vector<8x128xbf16>,
    %c0_6 = arith.constant 0 : index
    %c0_7 = arith.constant 0 : index
    %5 = vector.load %arg6[%c0_6, %c0_7] : memref<8x256xbf16, #tpu.memory_space<vmem>>, vector<8x256xbf16>
    %c0_8 = arith.constant 0 : index
    %c0_9 = arith.constant 0 : index
    %6 = vector.load %arg3[%c0_8, %c0_9] : memref<256x512xbf16, #tpu.memory_space<vmem>>, vector<256x512xbf16>
    %cst = arith.constant dense<0.000000e+00> : vector<8x512xf32>
    %7 = tpu.matmul %5, %6, %cst {dimension_numbers = #tpu.dot_dimension_numbers<[1], [0], [0], [1], [0, 0, 1, 1], [], []>} : vector<8x256xbf16>, vector<256x512xbf16>, vector<8x512xf32> -> vector<8x512xf32>
    %c0_10 = arith.constant 0 : index
    %c0_11 = arith.constant 0 : index
    %8 = vector.load %arg4[%c0_10, %c0_11] : memref<1x512xf32, #tpu.memory_space<vmem>>, vector<1x512xf32>
    %9 = vector.broadcast %8 : vector<1x512xf32> to vector<8x512xf32>
    %10 = arith.addf %7, %9 : vector<8x512xf32>
    %11 = vector.extract_strided_slice %10 {offsets = [0, 0], sizes = [8, 128], strides = [1, 1]} : vector<8x512xf32> to vector<8x128xf32>
    %12 = arith.negf %11 : vector<8x128xf32>
    %13 = math.exp %12 : vector<8x128xf32>
    %cst_12 = arith.constant 1.000000e+00 : f32
    %14 = vector.broadcast %cst_12 : f32 to vector<8x128xf32>
    %15 = arith.addf %14, %13 : vector<8x128xf32>
    %16 = arith.divf %14, %15 : vector<8x128xf32>
    %17 = vector.extract_strided_slice %10 {offsets = [0, 128], sizes = [8, 128], strides = [1, 1]} : vector<8x512xf32> to vector<8x128xf32>
    %18 = arith.negf %17 : vector<8x128xf32>
    %19 = math.exp %18 : vector<8x128xf32>
    %cst_13 = arith.constant 1.000000e+00 : f32
    %20 = vector.broadcast %cst_13 : f32 to vector<8x128xf32>
    %21 = arith.addf %20, %19 : vector<8x128xf32>
    %22 = arith.divf %20, %21 : vector<8x128xf32>
    %23 = vector.extract_strided_slice %10 {offsets = [0, 256], sizes = [8, 128], strides = [1, 1]} : vector<8x512xf32> to vector<8x128xf32>
    %24 = vector.extract_strided_slice %10 {offsets = [0, 384], sizes = [8, 128], strides = [1, 1]} : vector<8x512xf32> to vector<8x128xf32>
    %25 = arith.mulf %16, %24 : vector<8x128xf32>
    %26 = arith.addf %23, %25 : vector<8x128xf32>
    %27 = math.tanh %26 : vector<8x128xf32>
    %cst_14 = arith.constant 1.000000e+00 : f32
    %28 = vector.broadcast %cst_14 : f32 to vector<8x128xf32>
    %29 = arith.subf %28, %22 : vector<8x128xf32>
    %30 = arith.mulf %29, %27 : vector<8x128xf32>
    %31 = arith.mulf %22, %0 : vector<8x128xf32>
    %32 = arith.addf %30, %31 : vector<8x128xf32>
    %c0_15 = arith.constant 0 : index
    %c0_16 = arith.constant 0 : index
    %33 = vector.load %arg5[%c0_15, %c0_16] : memref<8x128xf32, #tpu.memory_space<vmem>>, vector<8x128xf32>
    tpu.vector_store %arg5[%c0_15, %c0_16], %32 {strides = array<i32>} : memref<8x128xf32, #tpu.memory_space<vmem>>, vector<8x128xf32>,
    return
  }
  func.func @transform_0(%arg0: i32) -> (i32, i32) {
    %c0_i32 = arith.constant 0 : i32
    %c0_i32_0 = arith.constant 0 : i32
    return %arg0, %c0_i32 : i32, i32
  }
  func.func @transform_1(%arg0: i32) -> (i32, i32) {
    %c0_i32 = arith.constant 0 : i32
    %c0_i32_0 = arith.constant 0 : i32
    return %arg0, %c0_i32 : i32, i32
  }
  func.func @transform_2(%arg0: i32) -> (i32, i32) {
    %c0_i32 = arith.constant 0 : i32
    %c0_i32_0 = arith.constant 0 : i32
    %c0_i32_1 = arith.constant 0 : i32
    return %c0_i32, %c0_i32_0 : i32, i32
  }
  func.func @transform_3(%arg0: i32) -> (i32, i32) {
    %c0_i32 = arith.constant 0 : i32
    %c0_i32_0 = arith.constant 0 : i32
    %c0_i32_1 = arith.constant 0 : i32
    return %c0_i32, %c0_i32_0 : i32, i32
  }
  func.func @transform_4(%arg0: i32) -> (i32, i32) {
    %c0_i32 = arith.constant 0 : i32
    %c0_i32_0 = arith.constant 0 : i32
    return %arg0, %c0_i32 : i32, i32
  }
}

module attributes {stable_mosaic.version = 11 : i64} {
  func.func @_gru_fused_kernel(%arg0: i32, %arg1: memref<8x128xbf16, #tpu.memory_space<vmem>>, %arg2: memref<8x128xf32, #tpu.memory_space<vmem>>, %arg3: memref<256x512xbf16, #tpu.memory_space<vmem>>, %arg4: memref<1x512xf32, #tpu.memory_space<vmem>>, %arg5: memref<8x128xf32, #tpu.memory_space<vmem>>, %arg6: memref<8x256xbf16, #tpu.memory_space<vmem>>) attributes {dimension_semantics = [#tpu.dimension_semantics<parallel>], iteration_bounds = array<i64: 1>, scalar_prefetch = 0 : i64, scratch_operands = 1 : i64, tpu.core_type = #tpu.core_type<tc>, window_params = [{transform_indices = @transform_0, window_bounds = array<i64: 8, 128>}, {transform_indices = @transform_1, window_bounds = array<i64: 8, 128>}, {pipeline_mode = #tpu.pipeline_mode<synchronous>, transform_indices = @transform_2, window_bounds = array<i64: 256, 512>}, {pipeline_mode = #tpu.pipeline_mode<synchronous>, transform_indices = @transform_3, window_bounds = array<i64: 1, 512>}, {transform_indices = @transform_4, window_bounds = array<i64: 8, 128>}]} {
    %c0 = arith.constant 0 : index
    %c0_0 = arith.constant 0 : index
    %0 = vector.load %arg2[%c0, %c0_0] : memref<8x128xf32, #tpu.memory_space<vmem>>, vector<8x128xf32>
    %c0_1 = arith.constant 0 : index
    %c0_2 = arith.constant 0 : index
    %1 = vector.load %arg1[%c0_1, %c0_2] : memref<8x128xbf16, #tpu.memory_space<vmem>>, vector<8x128xbf16>
    %c0_3 = arith.constant 0 : index
    %c0_4 = arith.constant 0 : index
    %2 = vector.load %arg6[%c0_3, %c0_4] : memref<8x256xbf16, #tpu.memory_space<vmem>>, vector<8x128xbf16>
    tpu.vector_store %arg6[%c0_3, %c0_4], %1 {strides = array<i32>} : memref<8x256xbf16, #tpu.memory_space<vmem>>, vector<8x128xbf16>,
    %3 = arith.truncf %0 : vector<8x128xf32> to vector<8x128xbf16>
    %c0_5 = arith.constant 0 : index
    %c128 = arith.constant 128 : index
    %4 = vector.load %arg6[%c0_5, %c128] : memref<8x256xbf16, #tpu.memory_space<vmem>>, vector<8x128xbf16>
    tpu.vector_store %arg6[%c0_5, %c128], %3 {strides = array<i32>} : memref<8x256xbf16, #tpu.memory_space<vmem>>, vector<8x128xbf16>,
    %c0_6 = arith.constant 0 : index
    %c0_7 = arith.constant 0 : index
    %5 = vector.load %arg6[%c0_6, %c0_7] : memref<8x256xbf16, #tpu.memory_space<vmem>>, vector<8x256xbf16>
    %c0_8 = arith.constant 0 : index
    %c0_9 = arith.constant 0 : index
    %6 = vector.load %arg3[%c0_8, %c0_9] : memref<256x512xbf16, #tpu.memory_space<vmem>>, vector<256x512xbf16>
    %cst = arith.constant dense<0.000000e+00> : vector<8x512xf32>
    %7 = tpu.matmul %5, %6, %cst {dimension_numbers = #tpu.dot_dimension_numbers<[1], [0], [0], [1], [0, 0, 1, 1], [], []>} : vector<8x256xbf16>, vector<256x512xbf16>, vector<8x512xf32> -> vector<8x512xf32>
    %c0_10 = arith.constant 0 : index
    %c0_11 = arith.constant 0 : index
    %8 = vector.load %arg4[%c0_10, %c0_11] : memref<1x512xf32, #tpu.memory_space<vmem>>, vector<1x512xf32>
    %9 = vector.broadcast %8 : vector<1x512xf32> to vector<8x512xf32>
    %10 = arith.addf %7, %9 : vector<8x512xf32>
    %11 = vector.extract_strided_slice %10 {offsets = [0, 0], sizes = [8, 128], strides = [1, 1]} : vector<8x512xf32> to vector<8x128xf32>
    %12 = arith.negf %11 : vector<8x128xf32>
    %13 = math.exp %12 : vector<8x128xf32>
    %cst_12 = arith.constant 1.000000e+00 : f32
    %14 = vector.broadcast %cst_12 : f32 to vector<8x128xf32>
    %15 = arith.addf %14, %13 : vector<8x128xf32>
    %16 = arith.divf %14, %15 : vector<8x128xf32>
    %17 = vector.extract_strided_slice %10 {offsets = [0, 128], sizes = [8, 128], strides = [1, 1]} : vector<8x512xf32> to vector<8x128xf32>
    %18 = arith.negf %17 : vector<8x128xf32>
    %19 = math.exp %18 : vector<8x128xf32>
    %cst_13 = arith.constant 1.000000e+00 : f32
    %20 = vector.broadcast %cst_13 : f32 to vector<8x128xf32>
    %21 = arith.addf %20, %19 : vector<8x128xf32>
    %22 = arith.divf %20, %21 : vector<8x128xf32>
    %23 = vector.extract_strided_slice %10 {offsets = [0, 256], sizes = [8, 128], strides = [1, 1]} : vector<8x512xf32> to vector<8x128xf32>
    %24 = vector.extract_strided_slice %10 {offsets = [0, 384], sizes = [8, 128], strides = [1, 1]} : vector<8x512xf32> to vector<8x128xf32>
    %25 = arith.mulf %16, %24 : vector<8x128xf32>
    %26 = arith.addf %23, %25 : vector<8x128xf32>
    %27 = math.tanh %26 : vector<8x128xf32>
    %cst_14 = arith.constant 1.000000e+00 : f32
    %28 = vector.broadcast %cst_14 : f32 to vector<8x128xf32>
    %29 = arith.subf %28, %22 : vector<8x128xf32>
    %30 = arith.mulf %29, %27 : vector<8x128xf32>
    %31 = arith.mulf %22, %0 : vector<8x128xf32>
    %32 = arith.addf %30, %31 : vector<8x128xf32>
    %c0_15 = arith.constant 0 : index
    %c0_16 = arith.constant 0 : index
    %33 = vector.load %arg5[%c0_15, %c0_16] : memref<8x128xf32, #tpu.memory_space<vmem>>, vector<8x128xf32>
    tpu.vector_store %arg5[%c0_15, %c0_16], %32 {strides = array<i32>} : memref<8x128xf32, #tpu.memory_space<vmem>>, vector<8x128xf32>,
    return
  }
  func.func @transform_0(%arg0: i32) -> (i32, i32) {
    %c0_i32 = arith.constant 0 : i32
    %c0_i32_0 = arith.constant 0 : i32
    return %arg0, %c0_i32 : i32, i32
  }
  func.func @transform_1(%arg0: i32) -> (i32, i32) {
    %c0_i32 = arith.constant 0 : i32
    %c0_i32_0 = arith.constant 0 : i32
    return %arg0, %c0_i32 : i32, i32
  }
  func.func @transform_2(%arg0: i32) -> (i32, i32) {
    %c0_i32 = arith.constant 0 : i32
    %c0_i32_0 = arith.constant 0 : i32
    %c0_i32_1 = arith.constant 0 : i32
    return %c0_i32, %c0_i32_0 : i32, i32
  }
  func.func @transform_3(%arg0: i32) -> (i32, i32) {
    %c0_i32 = arith.constant 0 : i32
    %c0_i32_0 = arith.constant 0 : i32
    %c0_i32_1 = arith.constant 0 : i32
    return %c0_i32, %c0_i32_0 : i32, i32
  }
  func.func @transform_4(%arg0: i32) -> (i32, i32) {
    %c0_i32 = arith.constant 0 : i32
    %c0_i32_0 = arith.constant 0 : i32
    return %arg0, %c0_i32 : i32, i32
  }
}

</mosaic_0001>

<bundles_post_ra>
// kernel: tpu_custom_call.1
= control target key start
LH: loop header
LB: loop body
LE: loop exit
PB: predicated region body
PF: predicated region fallthrough
CT: control target
= control target key end

     0   :  { %9 = vsyncpa [#allocation4], 0  ;;  %s955_s0 = inlined_call_operand.hbm [shape: bf16[8,128], index: 0, kind: input, shape index: {}]   ;;  %s956_s1 = inlined_call_operand.hbm [shape: f32[8,128], index: 1, kind: input, shape index: {}]   ;;  %s957_s2 = inlined_call_operand.hbm [shape: bf16[256,512], index: 2, kind: input, shape index: {}]   ;;  %s958_s3 = inlined_call_operand.vmem [shape: f32[1,512], index: 3, kind: input, shape index: {}]   ;;  %s959_s4 = inlined_call_operand.hbm [shape: f32[8,128], index: 4, kind: output, shape index: {}]  }
   0x1   :  { %10 = vsyncpa [#allocation7], 0 }
   0x2   :  { %11 = vsyncpa [#allocation5], 0  ;;  %s868_s15 = smov [#allocation6]   ;;  %s869_s17 = smov [#allocation3]  }
   0x3   :  { %s28_s16 = sshll.u32 %s868_s15, 4  ;;  %s18_s18 = sshll.u32 %s869_s17, 4  ;;  %s29_s16 = int_to_ptr.vmem [resolvable:$true] %s28_s16  ;;  %s19_s18 = int_to_ptr.vmem [resolvable:$true] %s18_s18 }
   0x4   :  { %s774_s21 = scalar_lea.hbm %s956_s1, 128 }
   0x5   :  { %p775_p0 = scmp.ne.s32.totalorder %s956_s1, %s774_s21  ;;  %p778_p1 = scmp.lt.u32.totalorder %s774_s21, %s956_s1 }
   0x7   :  { %p780_p2 = pnand %p778_p1, %p775_p0 }
   0x9   :  { %783 = shalt.err (!%p780_p2)
}
   0xa   :  { %s784_s26 = scalar_lea.vmem %s29_s16, 128  ;;  %p789_p4 = scmp.lt.s32.totalorder %s29_s16, %s29_s16 }
   0xb   :  { %p785_p3 = scmp.ne.s32.totalorder %s29_s16, %s784_s26  ;;  %p790_p5 = scmp.lt.s32.totalorder %s784_s26, %s784_s26 }
   0xd   :  { %p791_p6 = por %p790_p5, %p789_p4 }
   0xf   :  { %p792_p7 = pnand %p791_p6, %p785_p3 }
  0x11   :  { %795 = shalt.err (!%p792_p7)
}
  0x12   :  { %31 = dma.hbm_to_vmem [thread:$0]  %s956_s1, 128, %s29_s16, [#allocation7]  }
  0x13   :  { %s796_s5 = scalar_lea.hbm %s955_s0, 64 }
  0x14   :  { %p797_p8 = scmp.ne.s32.totalorder %s955_s0, %s796_s5  ;;  %p800_p9 = scmp.lt.u32.totalorder %s796_s5, %s955_s0 }
  0x16   :  { %p802_p10 = pnand %p800_p9, %p797_p8 }
  0x18   :  { %805 = shalt.err (!%p802_p10)
}
  0x19   :  { %s806_s10 = scalar_lea.vmem %s19_s18, 64  ;;  %p811_p12 = scmp.lt.s32.totalorder %s19_s18, %s19_s18 }
  0x1a   :  { %p807_p11 = scmp.ne.s32.totalorder %s19_s18, %s806_s10  ;;  %p812_p13 = scmp.lt.s32.totalorder %s806_s10, %s806_s10 }
  0x1c   :  { %p813_p0 = por %p812_p13, %p811_p12 }
  0x1e   :  { %p814_p1 = pnand %p813_p0, %p807_p11 }
  0x20   :  { %817 = shalt.err (!%p814_p1)
}
  0x21   :  { %21 = dma.hbm_to_vmem [thread:$0]  %s955_s0, 64, %s19_s18, [#allocation4]  }
  0x22   :  { %s870_s12 = smov [#allocation8]   ;;  %s818_s16 = scalar_lea.hbm %s957_s2, 8192 }
  0x23   :  { %s37_s13 = sshll.u32 %s870_s12, 4  ;;  %p819_p2 = scmp.ne.s32.totalorder %s957_s2, %s818_s16  ;;  %s38_s13 = int_to_ptr.vmem [resolvable:$true] %s37_s13 }
  0x24   :  { %p822_p3 = scmp.lt.u32.totalorder %s818_s16, %s957_s2 }
  0x26   :  { %p824_p4 = pnand %p822_p3, %p819_p2 }
  0x28   :  { %827 = shalt.err (!%p824_p4)
}
  0x29   :  { %s828_s22 = scalar_lea.vmem %s38_s13, 8192  ;;  %p833_p6 = scmp.lt.s32.totalorder %s38_s13, %s38_s13 }
  0x2a   :  { %p829_p5 = scmp.ne.s32.totalorder %s38_s13, %s828_s22  ;;  %p834_p7 = scmp.lt.s32.totalorder %s828_s22, %s828_s22 }
  0x2c   :  { %p835_p8 = por %p834_p7, %p833_p6 }
  0x2e   :  { %p836_p9 = pnand %p835_p8, %p829_p5 }
  0x30   :  { %839 = shalt.err (!%p836_p9)
}
  0x31   :  { %s871_s0 = smov 256   ;;  %s872_s18 = smov 16  }
  0x32   :  { %43 = dma.hbm_to_vmem [thread:$0]  %s957_s2, 8192, %s38_s13, [#allocation7], %s871_s0, %s871_s0, %s872_s18  }
  0x33   :  { %862 = dma.done.wait [#allocation4], 64  }
  0x34   :  { %863 = vsyncadd [#allocation4], 4294967232 }
  0x35   :  { %864 = dma.done.wait [#allocation7], 8320  }
  0x36   :  { %865 = vsyncadd [#allocation7], 4294958976  ;;  %v666_v0 = vld [vmem:[#allocation8 + $0x4] ss:$16 sps:$4 sm:$0xff]   ;;  %v668_v1 = vld [vmem:[#allocation8] ss:$16 sps:$4 sm:$0xff]  }
  0x37   :  { %474 = vmatprep.subr.bf16.mxu0 %v666_v0  ;;  %v669_v2 = vld [vmem:[#allocation8 + $0x24] ss:$16 sps:$4 sm:$0xff]   ;;  %v671_v3 = vld [vmem:[#allocation8 + $0x20] ss:$16 sps:$4 sm:$0xff]   ;;  %v684_v7 = vld [vmem:[#allocation8 + $0xc] ss:$16 sps:$4 sm:$0xff]  }
  0x38   :  { %475 = vmatpush1.bf16.msra.mxu0 %v668_v1  ;;  %v672_v4 = vld [vmem:[#allocation8 + $0x44] ss:$16 sps:$4 sm:$0xff]   ;;  %v674_v5 = vld [vmem:[#allocation8 + $0x40] ss:$16 sps:$4 sm:$0xff]   ;;  %v686_v8 = vld [vmem:[#allocation8 + $0x8] ss:$16 sps:$4 sm:$0xff]   ;;  %515 = vmatprep.subr.bf16.mxu1 %v684_v7 }
  0x39   :  { %476 = vmatprep.subr.bf16.mxu0 %v669_v2  ;;  %v675_v6 = vld [vmem:[#allocation8 + $0x64] ss:$16 sps:$4 sm:$0xff]   ;;  %v677_v9 = vld [vmem:[#allocation8 + $0x60] ss:$16 sps:$4 sm:$0xff]   ;;  %516 = vmatpush1.bf16.msra.mxu1 %v686_v8  ;;  %v690_v10 = vld [vmem:[#allocation8 + $0x2c] ss:$16 sps:$4 sm:$0xff]  }
  0x3a   :  { %v692_v11 = vld [vmem:[#allocation8 + $0x28] ss:$16 sps:$4 sm:$0xff]   ;;  %v678_v12 = vld [vmem:[#allocation8 + $0x84] ss:$16 sps:$4 sm:$0xff]   ;;  %517 = vmatprep.subr.bf16.mxu1 %v690_v10  ;;  %v680_v13 = vld [vmem:[#allocation8 + $0x80] ss:$16 sps:$4 sm:$0xff]  }
  0x3b   :  { %v696_v14 = vld [vmem:[#allocation8 + $0x4c] ss:$16 sps:$4 sm:$0xff]   ;;  %v681_v15 = vld [vmem:[#allocation8 + $0xa4] ss:$16 sps:$4 sm:$0xff]   ;;  %v698_v16 = vld [vmem:[#allocation8 + $0x48] ss:$16 sps:$4 sm:$0xff]  }
  0x3c   :  { %477 = vmatpush1.bf16.msra.mxu0 %v671_v3  ;;  %v702_v17 = vld [vmem:[#allocation8 + $0x6c] ss:$16 sps:$4 sm:$0xff]   ;;  %v683_v18 = vld [vmem:[#allocation8 + $0xa0] ss:$16 sps:$4 sm:$0xff]   ;;  %v687_v19 = vld [vmem:[#allocation8 + $0xc4] ss:$16 sps:$4 sm:$0xff]  }
  0x3d   :  { %478 = vmatprep.subr.bf16.mxu0 %v672_v4  ;;  %518 = vmatpush1.bf16.msra.mxu1 %v692_v11  ;;  %v704_v20 = vld [vmem:[#allocation8 + $0x68] ss:$16 sps:$4 sm:$0xff]   ;;  %v708_v21 = vld [vmem:[#allocation8 + $0x8c] ss:$16 sps:$4 sm:$0xff]   ;;  %v689_v22 = vld [vmem:[#allocation8 + $0xc0] ss:$16 sps:$4 sm:$0xff]  }
  0x3e   :  { %519 = vmatprep.subr.bf16.mxu1 %v696_v14  ;;  %v693_v23 = vld [vmem:[#allocation8 + $0xe4] ss:$16 sps:$4 sm:$0xff]   ;;  %v710_v24 = vld [vmem:[#allocation8 + $0x88] ss:$16 sps:$4 sm:$0xff]   ;;  %v714_v25 = vld [vmem:[#allocation8 + $0xac] ss:$16 sps:$4 sm:$0xff]  }
  0x3f   :  { %v695_v26 = vld [vmem:[#allocation8 + $0xe0] ss:$16 sps:$4 sm:$0xff]   ;;  %v699_v27 = vld [vmem:[#allocation8 + $0x104] ss:$16 sps:$4 sm:$0xff]   ;;  %v716_v28 = vld [vmem:[#allocation8 + $0xa8] ss:$16 sps:$4 sm:$0xff]  }
  0x40   :  { %479 = vmatpush1.bf16.msra.mxu0 %v674_v5  ;;  %v720_v29 = vld [vmem:[#allocation8 + $0xcc] ss:$16 sps:$4 sm:$0xff]   ;;  %v701_v30 = vld [vmem:[#allocation8 + $0x100] ss:$16 sps:$4 sm:$0xff]   ;;  %v705_v31 = vld [vmem:[#allocation8 + $0x124] ss:$16 sps:$4 sm:$0xff]  }
  0x41   :  { %480 = vmatprep.subr.bf16.mxu0 %v675_v6  ;;  %520 = vmatpush1.bf16.msra.mxu1 %v698_v16  ;;  %v722_v32 = vld [vmem:[#allocation8 + $0xc8] ss:$16 sps:$4 sm:$0xff]   ;;  %v726_v33 = vld [vmem:[#allocation8 + $0xec] ss:$16 sps:$4 sm:$0xff]   ;;  %v707_v34 = vld [vmem:[#allocation8 + $0x120] ss:$16 sps:$4 sm:$0xff]   ;;  %v127_v6 = vlaneseq }
  0x42   :  { %521 = vmatprep.subr.bf16.mxu1 %v702_v17  ;;  %v711_v35 = vld [vmem:[#allocation8 + $0x144] ss:$16 sps:$4 sm:$0xff]   ;;  %v728_v36 = vld [vmem:[#allocation8 + $0xe8] ss:$16 sps:$4 sm:$0xff]   ;;  %v732_v38 = vld [vmem:[#allocation8 + $0x10c] ss:$16 sps:$4 sm:$0xff]  }
  0x43   :  { %v935_v37 = vld [vmem:[#allocation6] sm:$0xff]  ;;  %v56_v39 = vld [vmem:[#allocation3] sm:$0xf]  ;;  %v713_v41 = vld [vmem:[#allocation8 + $0x140] ss:$16 sps:$4 sm:$0xff]   ;;  %v128_v7 = vshrl.u32 %v127_v6, 7 }
  0x44   :  { %481 = vmatpush1.bf16.msra.mxu0 %v677_v9  ;;  %v58_v40 = vpack.c.bf16 %v935_v37, %v935_v37  ;;  %57 = vst [vmem:[#allocation2] sm:$0xf] %v56_v39  ;;  %v734_v42 = vld [vmem:[#allocation8 + $0x108] ss:$16 sps:$4 sm:$0xff]   ;;  %v717_v43 = vld [vmem:[#allocation8 + $0x164] ss:$16 sps:$4 sm:$0xff]  }
  0x45   :  { %482 = vmatprep.subr.bf16.mxu0 %v678_v12  ;;  %522 = vmatpush1.bf16.msra.mxu1 %v704_v20  ;;  %v738_v44 = vld [vmem:[#allocation8 + $0x12c] ss:$16 sps:$4 sm:$0xff]   ;;  %v719_v45 = vld [vmem:[#allocation8 + $0x160] ss:$16 sps:$4 sm:$0xff]   ;;  %v740_v46 = vld [vmem:[#allocation8 + $0x128] ss:$16 sps:$4 sm:$0xff]  }
  0x46   :  { %523 = vmatprep.subr.bf16.mxu1 %v708_v21  ;;  %59 = vst [vmem:[#allocation2 + $0x4] sm:$0xf] %v58_v40  ;;  %v723_v47 = vld [vmem:[#allocation8 + $0x184] ss:$16 sps:$4 sm:$0xff]   ;;  %v744_v48 = vld [vmem:[#allocation8 + $0x14c] ss:$16 sps:$4 sm:$0xff]  }
  0x47   :  { %v725_v51 = vld [vmem:[#allocation8 + $0x180] ss:$16 sps:$4 sm:$0xff]   ;;  %v748_v52 = vld [vmem:[#allocation8 + $0x148] ss:$16 sps:$4 sm:$0xff]   ;;  %v729_v53 = vld [vmem:[#allocation8 + $0x1a4] ss:$16 sps:$4 sm:$0xff]  }
  0x48   :  { %483 = vmatpush1.bf16.msra.mxu0 %v680_v13  ;;  %v749_v54 = vld [vmem:[#allocation8 + $0x16c] ss:$16 sps:$4 sm:$0xff]   ;;  %v731_v55 = vld [vmem:[#allocation8 + $0x1a0] ss:$16 sps:$4 sm:$0xff]   ;;  %v751_v56 = vld [vmem:[#allocation8 + $0x168] ss:$16 sps:$4 sm:$0xff]  }
  0x49   :  { %484 = vmatprep.subr.bf16.mxu0 %v681_v15  ;;  %524 = vmatpush1.bf16.msra.mxu1 %v710_v24  ;;  %v735_v57 = vld [vmem:[#allocation8 + $0x1c4] ss:$16 sps:$4 sm:$0xff]   ;;  %v752_v58 = vld [vmem:[#allocation8 + $0x18c] ss:$16 sps:$4 sm:$0xff]   ;;  %v737_v59 = vld [vmem:[#allocation8 + $0x1c0] ss:$16 sps:$4 sm:$0xff]  }
  0x4a   :  { %525 = vmatprep.subr.bf16.mxu1 %v714_v25  ;;  %v754_v60 = vld [vmem:[#allocation8 + $0x188] ss:$16 sps:$4 sm:$0xff]   ;;  %v741_v61 = vld [vmem:[#allocation8 + $0x1e4] ss:$16 sps:$4 sm:$0xff]   ;;  %v755_v62 = vld [vmem:[#allocation8 + $0x1ac] ss:$16 sps:$4 sm:$0xff]  }
  0x4b   :  { %v743_v63 = vld [vmem:[#allocation8 + $0x1e0] ss:$16 sps:$4 sm:$0xff]   ;;  %v757_v0 = vld [vmem:[#allocation8 + $0x1a8] ss:$16 sps:$4 sm:$0xff]   ;;  %v758_v1 = vld [vmem:[#allocation8 + $0x1cc] ss:$16 sps:$4 sm:$0xff]  }
  0x4c   :  { %485 = vmatpush1.bf16.msra.mxu0 %v683_v18  ;;  %v760_v3 = vld [vmem:[#allocation8 + $0x1c8] ss:$16 sps:$4 sm:$0xff]   ;;  %v761_v4 = vld [vmem:[#allocation8 + $0x1ec] ss:$16 sps:$4 sm:$0xff]   ;;  %v129_v8 = vsub.s32 0, %v128_v7  ;;  %v133_v10 = vsub.s32 1, %v128_v7 }
  0x4d   :  { %486 = vmatprep.subr.bf16.mxu0 %v687_v19  ;;  %526 = vmatpush1.bf16.msra.mxu1 %v716_v28  ;;  %v60_v49 = vld [vmem:[#allocation2] sm:$0xff]  ;;  %v763_v5 = vld [vmem:[#allocation8 + $0x1e8] ss:$16 sps:$4 sm:$0xff]   ;;  %v137_v28 = vsub.s32 2, %v128_v7 }
  0x4e   :  { %527 = vmatprep.subr.bf16.mxu1 %v720_v29  ;;  %v593_v50 = vcombine.high %v60_v49, %v60_v49  ;;  %v592_v2 = vcombine.low %v60_v49, %v60_v49  ;;  %v125_v9 = vld [vmem:[%s958_s3] sm:$0xf]  ;;  %s873_s3 = smov [#allocation9]  }
  0x4f   :  { %v130_v11 = vrot.slane %v125_v9, %v129_v8  ;;  %v134_v13 = vrot.slane %v125_v9, %v133_v10  ;;  %s582_s26 = sshll.u32 %s873_s3, 4  ;;  %s583_s26 = int_to_ptr.vmem [resolvable:$true] %s582_s26 }
  0x50   :  { %487 = vmatpush1.bf16.msra.mxu0 %v689_v22  ;;  %506 = vmatprep.mubr.bf16.mxu0 %v593_v50  ;;  %s840_s27 = scalar_lea.vmem %s583_s26, 128  ;;  %p845_p11 = scmp.lt.s32.totalorder %s583_s26, %s583_s26 }
  0x51   :  { %488 = vmatprep.subr.bf16.mxu0 %v693_v23  ;;  %528 = vmatpush1.bf16.msra.mxu1 %v722_v32  ;;  %v138_v32 = vrot.slane %v125_v9, %v137_v28  ;;  %p841_p10 = scmp.ne.s32.totalorder %s583_s26, %s840_s27  ;;  %p846_p12 = scmp.lt.s32.totalorder %s840_s27, %s840_s27 }
  0x52   :  { %529 = vmatprep.subr.bf16.mxu1 %v726_v33  ;;  %547 = vmatprep.mubr.bf16.mxu1 %v593_v50 }
  0x53   :  { %p847_p13 = por %p846_p12, %p845_p11 }
  0x54   :  { %489 = vmatpush1.bf16.msra.mxu0 %v695_v26 }
  0x55   :  { %490 = vmatprep.subr.bf16.mxu0 %v699_v27  ;;  %530 = vmatpush1.bf16.msra.mxu1 %v728_v36  ;;  %v141_v27 = vsub.s32 3, %v128_v7  ;;  %p848_p0 = pnand %p847_p13, %p841_p10 }
  0x56   :  { %531 = vmatprep.subr.bf16.mxu1 %v732_v38 }
  0x57   :  { %v142_v29 = vrot.slane %v125_v9, %v141_v27 }
  0x58   :  { %491 = vmatpush1.bf16.msra.mxu0 %v701_v30 }
  0x59   :  { %492 = vmatprep.subr.bf16.mxu0 %v705_v31  ;;  %532 = vmatpush1.bf16.msra.mxu1 %v734_v42 }
  0x5a   :  { %533 = vmatprep.subr.bf16.mxu1 %v738_v44 }
  0x5c   :  { %493 = vmatpush1.bf16.msra.mxu0 %v707_v34 }
  0x5d   :  { %494 = vmatprep.subr.bf16.mxu0 %v711_v35  ;;  %534 = vmatpush1.bf16.msra.mxu1 %v740_v46 }
  0x5e   :  { %535 = vmatprep.subr.bf16.mxu1 %v744_v48 }
  0x60   :  { %495 = vmatpush1.bf16.msra.mxu0 %v713_v41 }
  0x61   :  { %496 = vmatprep.subr.bf16.mxu0 %v717_v43  ;;  %536 = vmatpush1.bf16.msra.mxu1 %v748_v52 }
  0x62   :  { %537 = vmatprep.subr.bf16.mxu1 %v749_v54 }
  0x64   :  { %497 = vmatpush1.bf16.msra.mxu0 %v719_v45 }
  0x65   :  { %498 = vmatprep.subr.bf16.mxu0 %v723_v47  ;;  %538 = vmatpush1.bf16.msra.mxu1 %v751_v56 }
  0x66   :  { %539 = vmatprep.subr.bf16.mxu1 %v752_v58 }
  0x68   :  { %499 = vmatpush1.bf16.msra.mxu0 %v725_v51 }
  0x69   :  { %500 = vmatprep.subr.bf16.mxu0 %v729_v53  ;;  %540 = vmatpush1.bf16.msra.mxu1 %v754_v60 }
  0x6a   :  { %541 = vmatprep.subr.bf16.mxu1 %v755_v62 }
  0x6c   :  { %501 = vmatpush1.bf16.msra.mxu0 %v731_v55 }
  0x6d   :  { %502 = vmatprep.subr.bf16.mxu0 %v735_v57  ;;  %542 = vmatpush1.bf16.msra.mxu1 %v757_v0 }
  0x6e   :  { %543 = vmatprep.subr.bf16.mxu1 %v758_v1 }
  0x70   :  { %503 = vmatpush1.bf16.msra.mxu0 %v737_v59 }
  0x71   :  { %504 = vmatprep.subr.bf16.mxu0 %v741_v61  ;;  %544 = vmatpush1.bf16.msra.mxu1 %v760_v3 }
  0x72   :  { %545 = vmatprep.subr.bf16.mxu1 %v761_v4 }
  0x74   :  { %505 = vmatpush1.bf16.msra.mxu0 %v743_v63 }
  0x75   :  { %546 = vmatpush1.bf16.msra.mxu1 %v763_v5 }
  0x77   :  { %507 = vmatmul.mubr.bf16.vlgmr.msra.gmra.mrb[0].mxu0 %v592_v2 }
  0x78   :  { %548 = vmatmul.mubr.bf16.vlgmr.msra.gmra.mrb[0].mxu1 %v592_v2 }
 0x14a   :  { %v508_v12 = vpop.f32.mrb[0].mxu0 }
 0x14b   :  { %v509_v14 = vadd.f32 %v508_v12, %v130_v11  ;;  %v510_v15 = vpop.f32.mrb[1].mxu0  ;;  %v549_v21 = vpop.f32.mrb[0].mxu1 }
 0x14c   :  { %v512_v16 = vpop.f32.mrb[2].mxu0  ;;  %v511_v19 = vadd.f32 %v510_v15, %v134_v13  ;;  %v551_v22 = vpop.f32.mrb[1].mxu1  ;;  %v550_v35 = vadd.f32 %v549_v21, %v138_v32 }
 0x14d   :  { %v658_v17 = vmul.f32 -1.442695, %v509_v14  ;;  %v513_v18 = vpop.f32.mrb[3].mxu0  ;;  %v553_v23 = vpop.f32.mrb[2].mxu1  ;;  %v552_v33 = vadd.f32 %v551_v22, %v142_v29 }
 0x14e   :  { %v659_v20 = vmul.f32 -1.442695, %v511_v19  ;;  %v554_v24 = vpop.f32.mrb[3].mxu1 }
 0x14f   :  { %764 = vpow2.f32 %v658_v17 }
 0x150   :  { %766 = vpow2.f32 %v659_v20 }
 0x159   :  { %v765_v25 = vpop.eup %764 }
 0x15a   :  { %v559_v26 = vadd.f32 1.0, %v765_v25  ;;  %v767_v30 = vpop.eup %766 }
 0x15b   :  { %v565_v31 = vadd.f32 1.0, %v767_v30 }
 0x15c   :  { %768 = vrcp.f32 %v559_v26 }
 0x15d   :  { %770 = vrcp.f32 %v565_v31 }
 0x166   :  { %v769_v34 = vpop.eup %768 }
 0x167   :  { %v568_v36 = vmul.f32 %v769_v34, %v552_v33  ;;  %v771_v39 = vpop.eup %770 }
 0x168   :  { %v571_v40 = vsub.f32 1.0, %v771_v39  ;;  %v573_v43 = vmul.f32 %v771_v39, %v935_v37 }
 0x169   :  { %v569_v38 = vadd.f32 %v568_v36, %v550_v35 }
 0x16b   :  { %772 = vtanh.f32 %v569_v38 }
 0x175   :  { %v773_v41 = vpop.eup %772 }
 0x176   :  { %v572_v42 = vmul.f32 %v773_v41, %v571_v40 }
 0x178   :  { %v574_v44 = vadd.f32 %v573_v43, %v572_v42 }
 0x17a   :  { %575 = vst [vmem:[#allocation9] sm:$0xff] %v574_v44 }
 0x17b   :  { %851 = shalt.err (!%p848_p0)
}
 0x17c   :  { %s852_s30 = scalar_lea.hbm %s959_s4, 128 }
 0x17d   :  { %p853_p1 = scmp.ne.s32.totalorder %s959_s4, %s852_s30  ;;  %p856_p2 = scmp.lt.u32.totalorder %s852_s30, %s959_s4 }
 0x17f   :  { %p858_p3 = pnand %p856_p2, %p853_p1 }
 0x181   :  { %861 = shalt.err (!%p858_p3)
}
 0x182   :  { %585 = dma.vmem_to_hbm [thread:$0]  %s583_s26, 128, %s959_s4, [#allocation5]  }
 0x183   :  { %866 = dma.done.wait [#allocation5], 128  }
 0x184   :  { %867 = vsyncadd [#allocation5], 4294967168 }
 0x185   :  { %589 = vsyncpa [#allocation4], 1 }
 0x186   :  { %590 = vsyncpa [#allocation7], 1 }
 0x187   :  { %591 = vsyncpa [#allocation5], 1 }

// kernel: tpu_custom_call.1
= control target key start
LH: loop header
LB: loop body
LE: loop exit
PB: predicated region body
PF: predicated region fallthrough
CT: control target
= control target key end

     0   :  { %9 = vsyncpa [#allocation4], 0  ;;  %s955_s0 = inlined_call_operand.hbm [shape: bf16[8,128], index: 0, kind: input, shape index: {}]   ;;  %s956_s1 = inlined_call_operand.hbm [shape: f32[8,128], index: 1, kind: input, shape index: {}]   ;;  %s957_s2 = inlined_call_operand.hbm [shape: bf16[256,512], index: 2, kind: input, shape index: {}]   ;;  %s958_s3 = inlined_call_operand.vmem [shape: f32[1,512], index: 3, kind: input, shape index: {}]   ;;  %s959_s4 = inlined_call_operand.hbm [shape: f32[8,128], index: 4, kind: output, shape index: {}]  }
   0x1   :  { %10 = vsyncpa [#allocation7], 0 }
   0x2   :  { %11 = vsyncpa [#allocation5], 0  ;;  %s868_s15 = smov [#allocation6]   ;;  %s869_s17 = smov [#allocation3]  }
   0x3   :  { %s28_s16 = sshll.u32 %s868_s15, 4  ;;  %s18_s18 = sshll.u32 %s869_s17, 4  ;;  %s29_s16 = int_to_ptr.vmem [resolvable:$true] %s28_s16  ;;  %s19_s18 = int_to_ptr.vmem [resolvable:$true] %s18_s18 }
   0x4   :  { %s774_s21 = scalar_lea.hbm %s956_s1, 128 }
   0x5   :  { %p775_p0 = scmp.ne.s32.totalorder %s956_s1, %s774_s21  ;;  %p778_p1 = scmp.lt.u32.totalorder %s774_s21, %s956_s1 }
   0x7   :  { %p780_p2 = pnand %p778_p1, %p775_p0 }
   0x9   :  { %783 = shalt.err (!%p780_p2)
}
   0xa   :  { %s784_s26 = scalar_lea.vmem %s29_s16, 128  ;;  %p789_p4 = scmp.lt.s32.totalorder %s29_s16, %s29_s16 }
   0xb   :  { %p785_p3 = scmp.ne.s32.totalorder %s29_s16, %s784_s26  ;;  %p790_p5 = scmp.lt.s32.totalorder %s784_s26, %s784_s26 }
   0xd   :  { %p791_p6 = por %p790_p5, %p789_p4 }
   0xf   :  { %p792_p7 = pnand %p791_p6, %p785_p3 }
  0x11   :  { %795 = shalt.err (!%p792_p7)
}
  0x12   :  { %31 = dma.hbm_to_vmem [thread:$0]  %s956_s1, 128, %s29_s16, [#allocation7]  }
  0x13   :  { %s796_s5 = scalar_lea.hbm %s955_s0, 64 }
  0x14   :  { %p797_p8 = scmp.ne.s32.totalorder %s955_s0, %s796_s5  ;;  %p800_p9 = scmp.lt.u32.totalorder %s796_s5, %s955_s0 }
  0x16   :  { %p802_p10 = pnand %p800_p9, %p797_p8 }
  0x18   :  { %805 = shalt.err (!%p802_p10)
}
  0x19   :  { %s806_s10 = scalar_lea.vmem %s19_s18, 64  ;;  %p811_p12 = scmp.lt.s32.totalorder %s19_s18, %s19_s18 }
  0x1a   :  { %p807_p11 = scmp.ne.s32.totalorder %s19_s18, %s806_s10  ;;  %p812_p13 = scmp.lt.s32.totalorder %s806_s10, %s806_s10 }
  0x1c   :  { %p813_p0 = por %p812_p13, %p811_p12 }
  0x1e   :  { %p814_p1 = pnand %p813_p0, %p807_p11 }
  0x20   :  { %817 = shalt.err (!%p814_p1)
}
  0x21   :  { %21 = dma.hbm_to_vmem [thread:$0]  %s955_s0, 64, %s19_s18, [#allocation4]  }
  0x22   :  { %s870_s12 = smov [#allocation8]   ;;  %s818_s16 = scalar_lea.hbm %s957_s2, 8192 }
  0x23   :  { %s37_s13 = sshll.u32 %s870_s12, 4  ;;  %p819_p2 = scmp.ne.s32.totalorder %s957_s2, %s818_s16  ;;  %s38_s13 = int_to_ptr.vmem [resolvable:$true] %s37_s13 }
  0x24   :  { %p822_p3 = scmp.lt.u32.totalorder %s818_s16, %s957_s2 }
  0x26   :  { %p824_p4 = pnand %p822_p3, %p819_p2 }
  0x28   :  { %827 = shalt.err (!%p824_p4)
}
  0x29   :  { %s828_s22 = scalar_lea.vmem %s38_s13, 8192  ;;  %p833_p6 = scmp.lt.s32.totalorder %s38_s13, %s38_s13 }
  0x2a   :  { %p829_p5 = scmp.ne.s32.totalorder %s38_s13, %s828_s22  ;;  %p834_p7 = scmp.lt.s32.totalorder %s828_s22, %s828_s22 }
  0x2c   :  { %p835_p8 = por %p834_p7, %p833_p6 }
  0x2e   :  { %p836_p9 = pnand %p835_p8, %p829_p5 }
  0x30   :  { %839 = shalt.err (!%p836_p9)
}
  0x31   :  { %s871_s0 = smov 256   ;;  %s872_s18 = smov 16  }
  0x32   :  { %43 = dma.hbm_to_vmem [thread:$0]  %s957_s2, 8192, %s38_s13, [#allocation7], %s871_s0, %s871_s0, %s872_s18  }
  0x33   :  { %862 = dma.done.wait [#allocation4], 64  }
  0x34   :  { %863 = vsyncadd [#allocation4], 4294967232 }
  0x35   :  { %864 = dma.done.wait [#allocation7], 8320  }
  0x36   :  { %865 = vsyncadd [#allocation7], 4294958976  ;;  %v666_v0 = vld [vmem:[#allocation8 + $0x4] ss:$16 sps:$4 sm:$0xff]   ;;  %v668_v1 = vld [vmem:[#allocation8] ss:$16 sps:$4 sm:$0xff]  }
  0x37   :  { %474 = vmatprep.subr.bf16.mxu0 %v666_v0  ;;  %v669_v2 = vld [vmem:[#allocation8 + $0x24] ss:$16 sps:$4 sm:$0xff]   ;;  %v671_v3 = vld [vmem:[#allocation8 + $0x20] ss:$16 sps:$4 sm:$0xff]   ;;  %v684_v7 = vld [vmem:[#allocation8 + $0xc] ss:$16 sps:$4 sm:$0xff]  }
  0x38   :  { %475 = vmatpush1.bf16.msra.mxu0 %v668_v1  ;;  %v672_v4 = vld [vmem:[#allocation8 + $0x44] ss:$16 sps:$4 sm:$0xff]   ;;  %v674_v5 = vld [vmem:[#allocation8 + $0x40] ss:$16 sps:$4 sm:$0xff]   ;;  %v686_v8 = vld [vmem:[#allocation8 + $0x8] ss:$16 sps:$4 sm:$0xff]   ;;  %515 = vmatprep.subr.bf16.mxu1 %v684_v7 }
  0x39   :  { %476 = vmatprep.subr.bf16.mxu0 %v669_v2  ;;  %v675_v6 = vld [vmem:[#allocation8 + $0x64] ss:$16 sps:$4 sm:$0xff]   ;;  %v677_v9 = vld [vmem:[#allocation8 + $0x60] ss:$16 sps:$4 sm:$0xff]   ;;  %516 = vmatpush1.bf16.msra.mxu1 %v686_v8  ;;  %v690_v10 = vld [vmem:[#allocation8 + $0x2c] ss:$16 sps:$4 sm:$0xff]  }
  0x3a   :  { %v692_v11 = vld [vmem:[#allocation8 + $0x28] ss:$16 sps:$4 sm:$0xff]   ;;  %v678_v12 = vld [vmem:[#allocation8 + $0x84] ss:$16 sps:$4 sm:$0xff]   ;;  %517 = vmatprep.subr.bf16.mxu1 %v690_v10  ;;  %v680_v13 = vld [vmem:[#allocation8 + $0x80] ss:$16 sps:$4 sm:$0xff]  }
  0x3b   :  { %v696_v14 = vld [vmem:[#allocation8 + $0x4c] ss:$16 sps:$4 sm:$0xff]   ;;  %v681_v15 = vld [vmem:[#allocation8 + $0xa4] ss:$16 sps:$4 sm:$0xff]   ;;  %v698_v16 = vld [vmem:[#allocation8 + $0x48] ss:$16 sps:$4 sm:$0xff]  }
  0x3c   :  { %477 = vmatpush1.bf16.msra.mxu0 %v671_v3  ;;  %v702_v17 = vld [vmem:[#allocation8 + $0x6c] ss:$16 sps:$4 sm:$0xff]   ;;  %v683_v18 = vld [vmem:[#allocation8 + $0xa0] ss:$16 sps:$4 sm:$0xff]   ;;  %v687_v19 = vld [vmem:[#allocation8 + $0xc4] ss:$16 sps:$4 sm:$0xff]  }
  0x3d   :  { %478 = vmatprep.subr.bf16.mxu0 %v672_v4  ;;  %518 = vmatpush1.bf16.msra.mxu1 %v692_v11  ;;  %v704_v20 = vld [vmem:[#allocation8 + $0x68] ss:$16 sps:$4 sm:$0xff]   ;;  %v708_v21 = vld [vmem:[#allocation8 + $0x8c] ss:$16 sps:$4 sm:$0xff]   ;;  %v689_v22 = vld [vmem:[#allocation8 + $0xc0] ss:$16 sps:$4 sm:$0xff]  }
  0x3e   :  { %519 = vmatprep.subr.bf16.mxu1 %v696_v14  ;;  %v693_v23 = vld [vmem:[#allocation8 + $0xe4] ss:$16 sps:$4 sm:$0xff]   ;;  %v710_v24 = vld [vmem:[#allocation8 + $0x88] ss:$16 sps:$4 sm:$0xff]   ;;  %v714_v25 = vld [vmem:[#allocation8 + $0xac] ss:$16 sps:$4 sm:$0xff]  }
  0x3f   :  { %v695_v26 = vld [vmem:[#allocation8 + $0xe0] ss:$16 sps:$4 sm:$0xff]   ;;  %v699_v27 = vld [vmem:[#allocation8 + $0x104] ss:$16 sps:$4 sm:$0xff]   ;;  %v716_v28 = vld [vmem:[#allocation8 + $0xa8] ss:$16 sps:$4 sm:$0xff]  }
  0x40   :  { %479 = vmatpush1.bf16.msra.mxu0 %v674_v5  ;;  %v720_v29 = vld [vmem:[#allocation8 + $0xcc] ss:$16 sps:$4 sm:$0xff]   ;;  %v701_v30 = vld [vmem:[#allocation8 + $0x100] ss:$16 sps:$4 sm:$0xff]   ;;  %v705_v31 = vld [vmem:[#allocation8 + $0x124] ss:$16 sps:$4 sm:$0xff]  }
  0x41   :  { %480 = vmatprep.subr.bf16.mxu0 %v675_v6  ;;  %520 = vmatpush1.bf16.msra.mxu1 %v698_v16  ;;  %v722_v32 = vld [vmem:[#allocation8 + $0xc8] ss:$16 sps:$4 sm:$0xff]   ;;  %v726_v33 = vld [vmem:[#allocation8 + $0xec] ss:$16 sps:$4 sm:$0xff]   ;;  %v707_v34 = vld [vmem:[#allocation8 + $0x120] ss:$16 sps:$4 sm:$0xff]   ;;  %v127_v6 = vlaneseq }
  0x42   :  { %521 = vmatprep.subr.bf16.mxu1 %v702_v17  ;;  %v711_v35 = vld [vmem:[#allocation8 + $0x144] ss:$16 sps:$4 sm:$0xff]   ;;  %v728_v36 = vld [vmem:[#allocation8 + $0xe8] ss:$16 sps:$4 sm:$0xff]   ;;  %v732_v38 = vld [vmem:[#allocation8 + $0x10c] ss:$16 sps:$4 sm:$0xff]  }
  0x43   :  { %v935_v37 = vld [vmem:[#allocation6] sm:$0xff]  ;;  %v56_v39 = vld [vmem:[#allocation3] sm:$0xf]  ;;  %v713_v41 = vld [vmem:[#allocation8 + $0x140] ss:$16 sps:$4 sm:$0xff]   ;;  %v128_v7 = vshrl.u32 %v127_v6, 7 }
  0x44   :  { %481 = vmatpush1.bf16.msra.mxu0 %v677_v9  ;;  %v58_v40 = vpack.c.bf16 %v935_v37, %v935_v37  ;;  %57 = vst [vmem:[#allocation2] sm:$0xf] %v56_v39  ;;  %v734_v42 = vld [vmem:[#allocation8 + $0x108] ss:$16 sps:$4 sm:$0xff]   ;;  %v717_v43 = vld [vmem:[#allocation8 + $0x164] ss:$16 sps:$4 sm:$0xff]  }
  0x45   :  { %482 = vmatprep.subr.bf16.mxu0 %v678_v12  ;;  %522 = vmatpush1.bf16.msra.mxu1 %v704_v20  ;;  %v738_v44 = vld [vmem:[#allocation8 + $0x12c] ss:$16 sps:$4 sm:$0xff]   ;;  %v719_v45 = vld [vmem:[#allocation8 + $0x160] ss:$16 sps:$4 sm:$0xff]   ;;  %v740_v46 = vld [vmem:[#allocation8 + $0x128] ss:$16 sps:$4 sm:$0xff]  }
  0x46   :  { %523 = vmatprep.subr.bf16.mxu1 %v708_v21  ;;  %59 = vst [vmem:[#allocation2 + $0x4] sm:$0xf] %v58_v40  ;;  %v723_v47 = vld [vmem:[#allocation8 + $0x184] ss:$16 sps:$4 sm:$0xff]   ;;  %v744_v48 = vld [vmem:[#allocation8 + $0x14c] ss:$16 sps:$4 sm:$0xff]  }
  0x47   :  { %v725_v51 = vld [vmem:[#allocation8 + $0x180] ss:$16 sps:$4 sm:$0xff]   ;;  %v748_v52 = vld [vmem:[#allocation8 + $0x148] ss:$16 sps:$4 sm:$0xff]   ;;  %v729_v53 = vld [vmem:[#allocation8 + $0x1a4] ss:$16 sps:$4 sm:$0xff]  }
  0x48   :  { %483 = vmatpush1.bf16.msra.mxu0 %v680_v13  ;;  %v749_v54 = vld [vmem:[#allocation8 + $0x16c] ss:$16 sps:$4 sm:$0xff]   ;;  %v731_v55 = vld [vmem:[#allocation8 + $0x1a0] ss:$16 sps:$4 sm:$0xff]   ;;  %v751_v56 = vld [vmem:[#allocation8 + $0x168] ss:$16 sps:$4 sm:$0xff]  }
  0x49   :  { %484 = vmatprep.subr.bf16.mxu0 %v681_v15  ;;  %524 = vmatpush1.bf16.msra.mxu1 %v710_v24  ;;  %v735_v57 = vld [vmem:[#allocation8 + $0x1c4] ss:$16 sps:$4 sm:$0xff]   ;;  %v752_v58 = vld [vmem:[#allocation8 + $0x18c] ss:$16 sps:$4 sm:$0xff]   ;;  %v737_v59 = vld [vmem:[#allocation8 + $0x1c0] ss:$16 sps:$4 sm:$0xff]  }
  0x4a   :  { %525 = vmatprep.subr.bf16.mxu1 %v714_v25  ;;  %v754_v60 = vld [vmem:[#allocation8 + $0x188] ss:$16 sps:$4 sm:$0xff]   ;;  %v741_v61 = vld [vmem:[#allocation8 + $0x1e4] ss:$16 sps:$4 sm:$0xff]   ;;  %v755_v62 = vld [vmem:[#allocation8 + $0x1ac] ss:$16 sps:$4 sm:$0xff]  }
  0x4b   :  { %v743_v63 = vld [vmem:[#allocation8 + $0x1e0] ss:$16 sps:$4 sm:$0xff]   ;;  %v757_v0 = vld [vmem:[#allocation8 + $0x1a8] ss:$16 sps:$4 sm:$0xff]   ;;  %v758_v1 = vld [vmem:[#allocation8 + $0x1cc] ss:$16 sps:$4 sm:$0xff]  }
  0x4c   :  { %485 = vmatpush1.bf16.msra.mxu0 %v683_v18  ;;  %v760_v3 = vld [vmem:[#allocation8 + $0x1c8] ss:$16 sps:$4 sm:$0xff]   ;;  %v761_v4 = vld [vmem:[#allocation8 + $0x1ec] ss:$16 sps:$4 sm:$0xff]   ;;  %v129_v8 = vsub.s32 0, %v128_v7  ;;  %v133_v10 = vsub.s32 1, %v128_v7 }
  0x4d   :  { %486 = vmatprep.subr.bf16.mxu0 %v687_v19  ;;  %526 = vmatpush1.bf16.msra.mxu1 %v716_v28  ;;  %v60_v49 = vld [vmem:[#allocation2] sm:$0xff]  ;;  %v763_v5 = vld [vmem:[#allocation8 + $0x1e8] ss:$16 sps:$4 sm:$0xff]   ;;  %v137_v28 = vsub.s32 2, %v128_v7 }
  0x4e   :  { %527 = vmatprep.subr.bf16.mxu1 %v720_v29  ;;  %v593_v50 = vcombine.high %v60_v49, %v60_v49  ;;  %v592_v2 = vcombine.low %v60_v49, %v60_v49  ;;  %v125_v9 = vld [vmem:[%s958_s3] sm:$0xf]  ;;  %s873_s3 = smov [#allocation9]  }
  0x4f   :  { %v130_v11 = vrot.slane %v125_v9, %v129_v8  ;;  %v134_v13 = vrot.slane %v125_v9, %v133_v10  ;;  %s582_s26 = sshll.u32 %s873_s3, 4  ;;  %s583_s26 = int_to_ptr.vmem [resolvable:$true] %s582_s26 }
  0x50   :  { %487 = vmatpush1.bf16.msra.mxu0 %v689_v22  ;;  %506 = vmatprep.mubr.bf16.mxu0 %v593_v50  ;;  %s840_s27 = scalar_lea.vmem %s583_s26, 128  ;;  %p845_p11 = scmp.lt.s32.totalorder %s583_s26, %s583_s26 }
  0x51   :  { %488 = vmatprep.subr.bf16.mxu0 %v693_v23  ;;  %528 = vmatpush1.bf16.msra.mxu1 %v722_v32  ;;  %v138_v32 = vrot.slane %v125_v9, %v137_v28  ;;  %p841_p10 = scmp.ne.s32.totalorder %s583_s26, %s840_s27  ;;  %p846_p12 = scmp.lt.s32.totalorder %s840_s27, %s840_s27 }
  0x52   :  { %529 = vmatprep.subr.bf16.mxu1 %v726_v33  ;;  %547 = vmatprep.mubr.bf16.mxu1 %v593_v50 }
  0x53   :  { %p847_p13 = por %p846_p12, %p845_p11 }
  0x54   :  { %489 = vmatpush1.bf16.msra.mxu0 %v695_v26 }
  0x55   :  { %490 = vmatprep.subr.bf16.mxu0 %v699_v27  ;;  %530 = vmatpush1.bf16.msra.mxu1 %v728_v36  ;;  %v141_v27 = vsub.s32 3, %v128_v7  ;;  %p848_p0 = pnand %p847_p13, %p841_p10 }
  0x56   :  { %531 = vmatprep.subr.bf16.mxu1 %v732_v38 }
  0x57   :  { %v142_v29 = vrot.slane %v125_v9, %v141_v27 }
  0x58   :  { %491 = vmatpush1.bf16.msra.mxu0 %v701_v30 }
  0x59   :  { %492 = vmatprep.subr.bf16.mxu0 %v705_v31  ;;  %532 = vmatpush1.bf16.msra.mxu1 %v734_v42 }
  0x5a   :  { %533 = vmatprep.subr.bf16.mxu1 %v738_v44 }
  0x5c   :  { %493 = vmatpush1.bf16.msra.mxu0 %v707_v34 }
  0x5d   :  { %494 = vmatprep.subr.bf16.mxu0 %v711_v35  ;;  %534 = vmatpush1.bf16.msra.mxu1 %v740_v46 }
  0x5e   :  { %535 = vmatprep.subr.bf16.mxu1 %v744_v48 }
  0x60   :  { %495 = vmatpush1.bf16.msra.mxu0 %v713_v41 }
  0x61   :  { %496 = vmatprep.subr.bf16.mxu0 %v717_v43  ;;  %536 = vmatpush1.bf16.msra.mxu1 %v748_v52 }
  0x62   :  { %537 = vmatprep.subr.bf16.mxu1 %v749_v54 }
  0x64   :  { %497 = vmatpush1.bf16.msra.mxu0 %v719_v45 }
  0x65   :  { %498 = vmatprep.subr.bf16.mxu0 %v723_v47  ;;  %538 = vmatpush1.bf16.msra.mxu1 %v751_v56 }
  0x66   :  { %539 = vmatprep.subr.bf16.mxu1 %v752_v58 }
  0x68   :  { %499 = vmatpush1.bf16.msra.mxu0 %v725_v51 }
  0x69   :  { %500 = vmatprep.subr.bf16.mxu0 %v729_v53  ;;  %540 = vmatpush1.bf16.msra.mxu1 %v754_v60 }
  0x6a   :  { %541 = vmatprep.subr.bf16.mxu1 %v755_v62 }
  0x6c   :  { %501 = vmatpush1.bf16.msra.mxu0 %v731_v55 }
  0x6d   :  { %502 = vmatprep.subr.bf16.mxu0 %v735_v57  ;;  %542 = vmatpush1.bf16.msra.mxu1 %v757_v0 }
  0x6e   :  { %543 = vmatprep.subr.bf16.mxu1 %v758_v1 }
  0x70   :  { %503 = vmatpush1.bf16.msra.mxu0 %v737_v59 }
  0x71   :  { %504 = vmatprep.subr.bf16.mxu0 %v741_v61  ;;  %544 = vmatpush1.bf16.msra.mxu1 %v760_v3 }
  0x72   :  { %545 = vmatprep.subr.bf16.mxu1 %v761_v4 }
  0x74   :  { %505 = vmatpush1.bf16.msra.mxu0 %v743_v63 }
  0x75   :  { %546 = vmatpush1.bf16.msra.mxu1 %v763_v5 }
  0x77   :  { %507 = vmatmul.mubr.bf16.vlgmr.msra.gmra.mrb[0].mxu0 %v592_v2 }
  0x78   :  { %548 = vmatmul.mubr.bf16.vlgmr.msra.gmra.mrb[0].mxu1 %v592_v2 }
 0x14a   :  { %v508_v12 = vpop.f32.mrb[0].mxu0 }
 0x14b   :  { %v509_v14 = vadd.f32 %v508_v12, %v130_v11  ;;  %v510_v15 = vpop.f32.mrb[1].mxu0  ;;  %v549_v21 = vpop.f32.mrb[0].mxu1 }
 0x14c   :  { %v512_v16 = vpop.f32.mrb[2].mxu0  ;;  %v511_v19 = vadd.f32 %v510_v15, %v134_v13  ;;  %v551_v22 = vpop.f32.mrb[1].mxu1  ;;  %v550_v35 = vadd.f32 %v549_v21, %v138_v32 }
 0x14d   :  { %v658_v17 = vmul.f32 -1.442695, %v509_v14  ;;  %v513_v18 = vpop.f32.mrb[3].mxu0  ;;  %v553_v23 = vpop.f32.mrb[2].mxu1  ;;  %v552_v33 = vadd.f32 %v551_v22, %v142_v29 }
 0x14e   :  { %v659_v20 = vmul.f32 -1.442695, %v511_v19  ;;  %v554_v24 = vpop.f32.mrb[3].mxu1 }
 0x14f   :  { %764 = vpow2.f32 %v658_v17 }
 0x150   :  { %766 = vpow2.f32 %v659_v20 }
 0x159   :  { %v765_v25 = vpop.eup %764 }
 0x15a   :  { %v559_v26 = vadd.f32 1.0, %v765_v25  ;;  %v767_v30 = vpop.eup %766 }
 0x15b   :  { %v565_v31 = vadd.f32 1.0, %v767_v30 }
 0x15c   :  { %768 = vrcp.f32 %v559_v26 }
 0x15d   :  { %770 = vrcp.f32 %v565_v31 }
 0x166   :  { %v769_v34 = vpop.eup %768 }
 0x167   :  { %v568_v36 = vmul.f32 %v769_v34, %v552_v33  ;;  %v771_v39 = vpop.eup %770 }
 0x168   :  { %v571_v40 = vsub.f32 1.0, %v771_v39  ;;  %v573_v43 = vmul.f32 %v771_v39, %v935_v37 }
 0x169   :  { %v569_v38 = vadd.f32 %v568_v36, %v550_v35 }
 0x16b   :  { %772 = vtanh.f32 %v569_v38 }
 0x175   :  { %v773_v41 = vpop.eup %772 }
 0x176   :  { %v572_v42 = vmul.f32 %v773_v41, %v571_v40 }
 0x178   :  { %v574_v44 = vadd.f32 %v573_v43, %v572_v42 }
 0x17a   :  { %575 = vst [vmem:[#allocation9] sm:$0xff] %v574_v44 }
 0x17b   :  { %851 = shalt.err (!%p848_p0)
}
 0x17c   :  { %s852_s30 = scalar_lea.hbm %s959_s4, 128 }
 0x17d   :  { %p853_p1 = scmp.ne.s32.totalorder %s959_s4, %s852_s30  ;;  %p856_p2 = scmp.lt.u32.totalorder %s852_s30, %s959_s4 }
 0x17f   :  { %p858_p3 = pnand %p856_p2, %p853_p1 }
 0x181   :  { %861 = shalt.err (!%p858_p3)
}
 0x182   :  { %585 = dma.vmem_to_hbm [thread:$0]  %s583_s26, 128, %s959_s4, [#allocation5]  }
 0x183   :  { %866 = dma.done.wait [#allocation5], 128  }
 0x184   :  { %867 = vsyncadd [#allocation5], 4294967168 }
 0x185   :  { %589 = vsyncpa [#allocation4], 1 }
 0x186   :  { %590 = vsyncpa [#allocation7], 1 }
 0x187   :  { %591 = vsyncpa [#allocation5], 1 }

</bundles_post_ra>
